<compile_context>
chip_gen: v7x
topology: tpu7x:2x2x1
jax: 0.10.0
libtpu: 0.0.40
codegen_flags: <defaults>
</compile_context>

<pallas_src>
import jax
import jax.numpy as jnp
from jax.experimental import pallas as pl
from jax.experimental.pallas import tpu as pltpu

LANE = 128  # TPU lane width: output classes padded to a lane-dense slab.


def _round_up(x, m):
    return ((x + m - 1) // m) * m


def ensemble_kernel(x_ref, w_ref, b_ref, out_ref):
    """Fused ensemble forward for one batch tile.

    x_ref  : (bb, K)     compute_dtype -- input tile, K = C*HW (spatial folded in)
    w_ref  : (K, LANE)   compute_dtype -- effective weight, HW-replicated, 1/HW absorbed
    b_ref  : (1, LANE)   f32           -- effective bias
    out_ref: (bb, LANE)  f32           -- lane-dense logits (first NC columns valid)
    """
    out_ref[...] = (
        jnp.dot(x_ref[...], w_ref[...], preferred_element_type=jnp.float32)
        + b_ref[...]
    )


def ensemble_forward(x_nchw, w_models, b_models, w_cls, b_cls, *,
                     block_b=512, compute_dtype=jnp.bfloat16, x_buffers=2):
    B, C, H, W = x_nchw.shape
    M, _, NC = w_models.shape
    HW = H * W
    K = C * HW

    # ---- offline algebraic fold (plain JAX, f32) ---------------------------
    # logits_m = mean(x,(2,3)) @ w_m + b_m ; out = cat(logits, dim=1) @ w_cls + b_cls
    # Column order of wm_stacked matches torch.cat(outputs, dim=1).
    wm_stacked = jnp.transpose(w_models, (1, 0, 2)).reshape(C, M * NC)   # (C, M*NC)
    bm_concat = b_models.reshape(1, M * NC)                              # (1, M*NC)
    w_eff = (wm_stacked / HW) @ w_cls                                    # (C, NC); 1/HW absorbed
    b_eff = bm_concat @ w_cls + b_cls                                    # (1, NC)

    # Fold the spatial reduction into the MXU contraction:
    #   W_big[c*HW + hw, :] = w_eff[c, :]  =>  x.reshape(B, C*HW) @ W_big
    w_big = jnp.repeat(w_eff, HW, axis=0)                                # (K, NC)

    k_pad = _round_up(K, LANE)
    w_pad = jnp.zeros((k_pad, LANE), jnp.float32).at[:K, :NC].set(w_big)
    w_pad = w_pad.astype(compute_dtype)
    b_pad = jnp.zeros((1, LANE), jnp.float32).at[:, :NC].set(b_eff)

    # ---- batch tiling -------------------------------------------------------
    itemsize = jnp.dtype(compute_dtype).itemsize
    sub_align = 16 if itemsize == 2 else 8
    # Always >= 2 grid steps so v7x's two TensorCores both run; cap tile by block_b.
    bb = min(block_b, max(sub_align, _round_up(pl.cdiv(B, 2), sub_align)))
    n_steps = max(2, pl.cdiv(B, bb))
    b_rows = n_steps * bb
    grid = (n_steps,)

    # NOTE: the cast to compute_dtype is only "free" when x already arrives in
    # that dtype upstream; here it is one extra wrapper pass over x.
    x2 = x_nchw.reshape(B, K).astype(compute_dtype)
    pad_r, pad_k = b_rows - B, k_pad - K
    if pad_r or pad_k:
        x2 = jnp.pad(x2, ((0, pad_r), (0, pad_k)))

    # ---- cost hint & scoped-VMEM budget ------------------------------------
    cost = pl.CostEstimate(
        flops=int(2 * b_rows * k_pad * LANE + b_rows * LANE),
        transcendentals=0,
        bytes_accessed=int(itemsize * (b_rows * k_pad + k_pad * LANE)
                           + 4 * (LANE + b_rows * LANE)),
    )

    # Pallas allocates 2 buffers even for constant-index (weight) specs.
    need = (x_buffers * bb * k_pad * itemsize      # x tile buffers
            + 2 * k_pad * LANE * itemsize          # W_big (double-buffered)
            + 2 * LANE * 4                         # bias
            + 2 * bb * LANE * 4                    # out tile buffers
            + (4 << 20))                           # headroom
    try:
        vmem_cap = int(pltpu.get_tpu_info().vmem_capacity_bytes) * 3 // 4
    except Exception:  # pragma: no cover - conservative fallback
        vmem_cap = 48 << 20                        # safe under v7x's 64 MiB
    vmem_bytes = int(min(max(need, 8 << 20), vmem_cap))

    if x_buffers > 2:
        # Optional 3rd buffer if a profile shows exposed DMA at step boundaries.
        x_spec = pl.BlockSpec((bb, k_pad), lambda i: (i, 0),
                              pipeline_mode=pl.Buffered(x_buffers))
    else:
        x_spec = pl.BlockSpec((bb, k_pad), lambda i: (i, 0))

    out_padded = pl.pallas_call(
        ensemble_kernel,
        out_shape=jax.ShapeDtypeStruct((b_rows, LANE), jnp.float32),
        grid=grid,
        in_specs=[
            x_spec,                                         # batch-tiled, pipelined
            pl.BlockSpec((k_pad, LANE), lambda i: (0, 0)),  # VMEM-resident weights
            pl.BlockSpec((1, LANE), lambda i: (0, 0)),      # VMEM-resident bias
        ],
        out_specs=pl.BlockSpec((bb, LANE), lambda i: (i, 0)),
        compiler_params=pltpu.CompilerParams(
            dimension_semantics=("parallel",),              # 2-TC split on v7x
            vmem_limit_bytes=vmem_bytes,
        ),
        cost_estimate=cost,
    )(x2, w_pad, b_pad)

    return out_padded[:B, :NC]


def reference_forward(x_nchw, w_models, b_models, w_cls, b_cls):
    """Unfused f32 reference matching the PyTorch module's forward."""
    pooled = jnp.mean(x_nchw, axis=(2, 3))                   # (B, C)
    logits = [pooled @ w_models[m] + b_models[m, 0]
              for m in range(w_models.shape[0])]
    concat = jnp.concatenate(logits, axis=1)                 # torch.cat(dim=1)
    return concat @ w_cls + b_cls


if __name__ == "__main__":
    # Small, deterministic shapes consistent with the module's forward.
    B, C, H, W = 2, 4, 16, 16
    NUM_MODELS = 3          # DenseNet121, ResNet50, EfficientNet-B0 stand-ins
    NUM_CLASSES = 8

    key = jax.random.PRNGKey(0)
    kx, kw, kb, kcw, kcb = jax.random.split(key, 5)

    x = jax.random.normal(kx, (B, C, H, W), dtype=jnp.float32)

    # Per-model head weights: nn.Linear(C, NUM_CLASSES)-style uniform init,
    # stored pre-transposed as (M, C, NC).
    bound_h = 1.0 / jnp.sqrt(jnp.float32(C))
    w_models = jax.random.uniform(
        kw, (NUM_MODELS, C, NUM_CLASSES), minval=-bound_h, maxval=bound_h,
        dtype=jnp.float32)
    b_models = jax.random.uniform(
        kb, (NUM_MODELS, 1, NUM_CLASSES), minval=-bound_h, maxval=bound_h,
        dtype=jnp.float32)

    # Ensemble classifier: nn.Linear(NUM_MODELS * NUM_CLASSES, NUM_CLASSES),
    # stored pre-transposed as (M*NC, NC).
    fan_in = NUM_MODELS * NUM_CLASSES
    bound_c = 1.0 / jnp.sqrt(jnp.float32(fan_in))
    w_cls = jax.random.uniform(
        kcw, (fan_in, NUM_CLASSES), minval=-bound_c, maxval=bound_c,
        dtype=jnp.float32)
    b_cls = jax.random.uniform(
        kcb, (1, NUM_CLASSES), minval=-bound_c, maxval=bound_c,
        dtype=jnp.float32)

    ref = reference_forward(x, w_models, b_models, w_cls, b_cls)

    # Performance path: bf16 streaming + f32 MXU accumulation.
    out_bf16 = jax.block_until_ready(
        ensemble_forward(x, w_models, b_models, w_cls, b_cls,
                         compute_dtype=jnp.bfloat16))
    assert out_bf16.shape == (B, NUM_CLASSES)
    assert jnp.allclose(out_bf16, ref, atol=1e-2, rtol=1e-2), \
        float(jnp.max(jnp.abs(out_bf16 - ref)))

    # Full-precision path: tight tolerance against the unfused reference.
    out_f32 = jax.block_until_ready(
        ensemble_forward(x, w_models, b_models, w_cls, b_cls,
                         compute_dtype=jnp.float32))
    assert jnp.allclose(out_f32, ref, atol=1e-4, rtol=1e-4), \
        float(jnp.max(jnp.abs(out_f32 - ref)))

    print("KERNEL_OK")
</pallas_src>

<mosaic_0001>
module attributes {stable_mosaic.version = 11 : i64} {
  func.func @ensemble_kernel(%arg0: i32, %arg1: memref<16x1024xbf16, #tpu.memory_space<vmem>>, %arg2: memref<1024x128xbf16, #tpu.memory_space<vmem>>, %arg3: memref<1x128xf32, #tpu.memory_space<vmem>>, %arg4: memref<16x128xf32, #tpu.memory_space<vmem>>) attributes {dimension_semantics = [#tpu.dimension_semantics<parallel>], iteration_bounds = array<i64: 2>, scalar_prefetch = 0 : i64, scratch_operands = 0 : i64, tpu.core_type = #tpu.core_type<tc>, window_params = [{transform_indices = @transform_0, window_bounds = array<i64: 16, 1024>}, {pipeline_mode = #tpu.pipeline_mode<synchronous>, transform_indices = @transform_1, window_bounds = array<i64: 1024, 128>}, {pipeline_mode = #tpu.pipeline_mode<synchronous>, transform_indices = @transform_2, window_bounds = array<i64: 1, 128>}, {transform_indices = @transform_3, window_bounds = array<i64: 16, 128>}]} {
    %c0 = arith.constant 0 : index
    %c0_0 = arith.constant 0 : index
    %0 = vector.load %arg1[%c0, %c0_0] : memref<16x1024xbf16, #tpu.memory_space<vmem>>, vector<16x1024xbf16>
    %c0_1 = arith.constant 0 : index
    %c0_2 = arith.constant 0 : index
    %1 = vector.load %arg2[%c0_1, %c0_2] : memref<1024x128xbf16, #tpu.memory_space<vmem>>, vector<1024x128xbf16>
    %cst = arith.constant dense<0.000000e+00> : vector<16x128xf32>
    %2 = tpu.matmul %0, %1, %cst {dimension_numbers = #tpu.dot_dimension_numbers<[1], [0], [0], [1], [0, 0, 1, 1], [], []>} : vector<16x1024xbf16>, vector<1024x128xbf16>, vector<16x128xf32> -> vector<16x128xf32>
    %c0_3 = arith.constant 0 : index
    %c0_4 = arith.constant 0 : index
    %3 = vector.load %arg3[%c0_3, %c0_4] : memref<1x128xf32, #tpu.memory_space<vmem>>, vector<1x128xf32>
    %4 = vector.broadcast %3 : vector<1x128xf32> to vector<16x128xf32>
    %5 = arith.addf %2, %4 : vector<16x128xf32>
    %c0_5 = arith.constant 0 : index
    %c0_6 = arith.constant 0 : index
    %6 = vector.load %arg4[%c0_5, %c0_6] : memref<16x128xf32, #tpu.memory_space<vmem>>, vector<16x128xf32>
    tpu.vector_store %arg4[%c0_5, %c0_6], %5 {strides = array<i32>} : memref<16x128xf32, #tpu.memory_space<vmem>>, vector<16x128xf32>,
    return
  }
  func.func @transform_0(%arg0: i32) -> (i32, i32) {
    %c0_i32 = arith.constant 0 : i32
    %c0_i32_0 = arith.constant 0 : i32
    return %arg0, %c0_i32 : i32, i32
  }
  func.func @transform_1(%arg0: i32) -> (i32, i32) {
    %c0_i32 = arith.constant 0 : i32
    %c0_i32_0 = arith.constant 0 : i32
    %c0_i32_1 = arith.constant 0 : i32
    return %c0_i32, %c0_i32_0 : i32, i32
  }
  func.func @transform_2(%arg0: i32) -> (i32, i32) {
    %c0_i32 = arith.constant 0 : i32
    %c0_i32_0 = arith.constant 0 : i32
    %c0_i32_1 = arith.constant 0 : i32
    return %c0_i32, %c0_i32_0 : i32, i32
  }
  func.func @transform_3(%arg0: i32) -> (i32, i32) {
    %c0_i32 = arith.constant 0 : i32
    %c0_i32_0 = arith.constant 0 : i32
    return %arg0, %c0_i32 : i32, i32
  }
}

</mosaic_0001>

<bundles_post_ra>
// kernel: tpu_custom_call.1
= control target key start
LH: loop header
LB: loop body
LE: loop exit
PB: predicated region body
PF: predicated region fallthrough
CT: control target
= control target key end

     0   :  { %8 = vsyncpa [#allocation3], 0  ;;  %s1720_s0 = inlined_call_operand.hbm [shape: bf16[32,1024], index: 0, kind: input, shape index: {}]   ;;  %s1721_s1 = inlined_call_operand.hbm [shape: bf16[1024,128], index: 1, kind: input, shape index: {}]   ;;  %s1722_s2 = inlined_call_operand.vmem [shape: f32[1,128], index: 2, kind: input, shape index: {}]   ;;  %s1723_s3 = inlined_call_operand.hbm [shape: f32[32,128], index: 3, kind: output, shape index: {}]  }
   0x1   :  { %10 = vsyncpa [#allocation3 + $0x1], 0 }
   0x2   :  { %11 = vsyncpa [#allocation6], 0 }
   0x3   :  { %12 = vsyncpa [#allocation4], 0 }
   0x4   :  { %14 = vsyncpa [#allocation4 + $0x1], 0  ;;  %s1505_s12 = smov 0   ;;  %s1507_s13 = smov 0  }
   0x5   :  { %s1509_s14 = smov 0   ;;  %s1511_s15 = smov 0  }
   0x6 LB: > { %s1526_s16 = sadd.s32 4294967295, %s1474_s15   ;;  %s1038_s17 = sadd.s32 4294967294, %s1474_s15   ;;  %s1474_s15 = sphi %s1511_s15, %s1743_s15   ;;  %s1470_s14 = sphi %s1509_s14, %s1742_s14   ;;  %s1466_s13 = sphi %s1507_s13, %s1741_s13   ;;  %s1462_s12 = sphi %s1505_s12, %s1740_s12  }
   0x7   : > { %p40_p0 = scmp.ne.s32.totalorder %s1466_s13, %s1462_s12  ;;  %p1724_p1 = scmp.eq.s32.totalorder %s1526_s16, 0 }
   0x8   : > { %p112_p3 = scmp.eq.s32.totalorder %s1038_s17, 1  ;;  %p1039_p5 = scmp.ge.s32.totalorder %s1474_s15, 1 }
   0x9   : > { %p1535_p4 = por %p1724_p1, %p40_p0  ;;  %p119_p7 = scmp.lt.s32.totalorder %s1474_s15, 3 }
   0xa   : > { %p1540_p6 = por %p112_p3, %p40_p0  ;;  %s1476_s21 = smov [#allocation5]  }
   0xb   : > { %s1727_s18 = scalar_select %p1535_p4, 1, 0 }
   0xc   : > { %s1728_s19 = scalar_select %p1540_p6, 1, 0 }
   0xd   : > { %p1545_p8 = pnand %p1039_p5, %p119_p7  ;;  %s131_s22 = sshll.u32 %s1476_s21, 4  ;;  %s1549_s22 = int_to_ptr.vmem [resolvable:$true] %s131_s22 }
   0xe   : > { %s1561_s24 = sadd.s32 1, %s1474_s15   ;;  %s27_s25 = sadd.s32 1, %s1470_s14 }
   0xf   : > { %s1729_s20 = scalar_select %p1545_p8, 1, 0 }
  0x10   : > { %p1227_p9 = pneg %p1545_p8  ;;  %s24_s26 = ssub.s32 %s1474_s15, %s1561_s24 }
  0x11   : > { %s1346_s29 = scalar_lea.hbm %s1721_s1, 8192 }
  0x12   : > { %p1556_p11 = pnand %p1227_p9, %p1724_p1  ;;  %p1347_p12 = scmp.ne.s32.totalorder %s1721_s1, %s1346_s29 }
  0x13   : > { %p1353_p5 = scmp.lt.u32.totalorder %s1346_s29, %s1721_s1 }
  0x14   : > { %p1348_p13 = pneg %p1556_p11 }
  0x16   : > { %p1349_p0 = pnand %p1348_p13, %p1347_p12 }
  0x18   : > { %p1350_p3 = pneg %p1349_p0 }
  0x1a   : > { %p1355_p7 = pnand %p1353_p5, %p1350_p3 }
  0x1c   : > { %1358 = shalt.err (!%p1355_p7)
}
  0x1d   : > { %s1359_s7 = scalar_lea.vmem %s1549_s22, 8192  ;;  %p1367_p2 = scmp.lt.s32.totalorder %s1549_s22, %s1549_s22 }
  0x1e   : > { %p1360_p9 = scmp.ne.s32.totalorder %s1549_s22, %s1359_s7  ;;  %p1368_p6 = scmp.lt.s32.totalorder %s1359_s7, %s1359_s7 }
  0x20   : > { %p1362_p10 = pnand %p1360_p9, %p1348_p13  ;;  %p1369_p4 = por %p1368_p6, %p1367_p2 }
  0x22   : > { %p1363_p1 = pneg %p1362_p10 }
  0x24   : > { %p1370_p8 = pnand %p1369_p4, %p1363_p1 }
  0x26   : > { %1373 = shalt.err (!%p1370_p8)
}
  0x27   : > { %s1477_s8 = smov 64   ;;  %s1478_s9 = smov 4  }
  0x28   : > { %1230 = dma.hbm_to_vmem [thread:$0]  (!%p1556_p11), %s1721_s1, 8192, %s1549_s22, [#allocation6], %s1477_s8, %s1477_s8, %s1478_s9  }
  0x29   : > { %p25_p2 = scmp.eq.s32.totalorder %s24_s26, 0  ;;  %p34_p1 = scmp.ne.s32.totalorder %s1470_s14, %s1466_s13 }
  0x2a   : > { %p35_p4 = scmp.eq.s32.totalorder %s1474_s15, 0  ;;  %p1240_p6 = scmp.lt.s32.totalorder %s1474_s15, 2 }
  0x2b   : > { %s1592_s17 = scalar_select %p25_p2, %s1470_s14, %s27_s25  }
  0x2c   : > { %p36_p8 = por %p35_p4, %p34_p1  ;;  %p1731_p10 = scmp.eq.s32.totalorder %s1526_s16, 1 }
  0x2d   : > { %s148_s27 = sand.u32 1, %s1470_s14   ;;  %s1129_s28 = sshll.u32 %s1474_s15, 10 }
  0x2e   : > { %p1596_p12 = por %p1731_p10, %p34_p1  ;;  %s1042_s29 = sshll.u32 %s148_s27, 6 }
  0x2f   : > { %s1605_s4 = scalar_lea.hbm %s1720_s0, %s1129_s28  ;;  %s152_s22 = scalar_lea.vmem [#allocation2], %s1042_s29 }
  0x30   : > { %s160_s25 = sshll.u32 %s152_s22, 4  ;;  %p1607_p11 = pnand %p1240_p6, %p36_p8  ;;  %s1611_s25 = int_to_ptr.vmem [resolvable:$true] %s160_s25 }
  0x31   : > { %s1613_s5 = scalar_lea.sflag [#allocation3], %s148_s27  ;;  %s1374_s6 = scalar_lea.hbm %s1605_s4, 1024 }
  0x32   : > { %p1375_p13 = scmp.ne.s32.totalorder %s1605_s4, %s1374_s6  ;;  %p1376_p0 = pneg %p1607_p11 }
  0x33   : > { %s1379_s9 = scalar_lea.hbm %s1720_s0, 2048  ;;  %p1380_p7 = scmp.lt.u32.totalorder %s1605_s4, %s1720_s0 }
  0x34   : > { %p1377_p3 = pnand %p1376_p0, %p1375_p13  ;;  %p1381_p9 = scmp.lt.u32.totalorder %s1379_s9, %s1374_s6 }
  0x35   : > { %p1383_p1 = scmp.lt.u32.totalorder %s1374_s6, %s1605_s4 }
  0x36   : > { %p1378_p5 = pneg %p1377_p3  ;;  %p1382_p2 = por %p1381_p9, %p1380_p7 }
  0x38   : > { %p1384_p4 = por %p1383_p1, %p1382_p2 }
  0x3a   : > { %p1385_p6 = pnand %p1384_p4, %p1378_p5 }
  0x3c   : > { %1388 = shalt.err (!%p1385_p6)
}
  0x3d   : > { %s1389_s27 = scalar_lea.vmem %s1611_s25, 1024  ;;  %s1479_s28 = smov [#allocation2]  }
  0x3e   : > { %p1390_p8 = scmp.ne.s32.totalorder %s1611_s25, %s1389_s27  ;;  %s1394_s29 = sshll.u32 %s1479_s28, 4  ;;  %s1395_s29 = int_to_ptr.vmem [resolvable:$false] %s1394_s29 }
  0x3f   : > { %s1396_s23 = scalar_lea.vmem %s1395_s29, 2048  ;;  %p1397_p3 = scmp.lt.s32.totalorder %s1611_s25, %s1395_s29 }
  0x40   : > { %p1392_p10 = pnand %p1390_p8, %p1376_p0  ;;  %p1398_p7 = scmp.lt.s32.totalorder %s1396_s23, %s1389_s27 }
  0x42   : > { %p1393_p13 = pneg %p1392_p10  ;;  %p1399_p9 = por %p1398_p7, %p1397_p3 }
  0x44   : > { %p1400_p2 = pnand %p1399_p9, %p1393_p13 }
  0x46   : > { %1403 = shalt.err (!%p1400_p2)
}
  0x47   : > { %s1480_s30 = smov 512   ;;  %s1481_s22 = smov 32  }
  0x48   : > { %1234 = dma.hbm_to_vmem [thread:$0]  (!%p1607_p11), %s1605_s4, 1024, %s1611_s25, %s1613_s5, %s1480_s30, %s1480_s30, %s1481_s22  }
  0x49   : > { %p1734_p0 = scmp.ne.s32.totalorder %s1729_s20, 0 }
  0x4a   : > { %s1644_s6 = sand.u32 (!%p1734_p0), 1, %s1466_s13   ;;  %p1735_p5 = scmp.ne.s32.totalorder (!%p1734_p0), %s1727_s18, 0 }
  0x4b   : > { %172 = sbr.rel (%p1734_p0) target bundleno = 388 (0x184), region = 32  ;;  %s1047_s7 = sshll.u32 (!%p1734_p0), %s1644_s6, 6 }
  0x4c   : > { %s175_s8 = scalar_lea.sflag (!%p1734_p0), [#allocation3], %s1644_s6  ;;  %s1648_s9 = scalar_lea.vmem (!%p1734_p0), [#allocation2], %s1047_s7 }
  0x52   : > { %1449 = dma.done.wait (%p1735_p5), %s175_s8, 1024  }
  0x53   : > { %1451 = vsyncadd (%p1735_p5), %s175_s8, 4294966272  ;;  %p1736_p11 = scmp.eq.s32.totalorder %s1526_s16, 0 }
  0x55   : > { %1453 = dma.done.wait (%p1736_p11), [#allocation6], 8192   ;;  %p1737_p1 = pmov %p1736_p11 }
  0x56   : > { %v1282_v0 = vld [vmem:[#allocation5 + $0x40] sm:$0xff]   ;;  %v1286_v4 = vld [vmem:[#allocation5 + $0x48] sm:$0xff]   ;;  %v1290_v8 = vld [vmem:[#allocation5 + $0x50] sm:$0xff]   ;;  %s1049_s4 = sshll.u32 %s1644_s6, 4  ;;  %s1130_s5 = sshll.u32 %s1526_s16, 8 }
  0x57   : > { %1455 = vsyncadd (%p1737_p1), [#allocation6], 4294959104  ;;  %v1283_v1 = vld [vmem:[#allocation5 + $0xc0] sm:$0xff]   ;;  %1131 = vmatprep.subr.bf16.mxu0 %v1282_v0  ;;  %v1287_v5 = vld [vmem:[#allocation5 + $0xc8] sm:$0xff]   ;;  %s204_s25 = scalar_lea.vmem [#allocation7], %s1049_s4  ;;  %s1676_s27 = scalar_lea.hbm %s1723_s3, %s1130_s5 }
  0x58   : > { %v1284_v2 = vld [vmem:[#allocation5] sm:$0xff]   ;;  %1153 = vmatprep.subr.bf16.mxu1 %v1283_v1  ;;  %v1288_v6 = vld [vmem:[#allocation5 + $0x8] sm:$0xff]   ;;  %v1291_v9 = vld [vmem:[#allocation5 + $0xd0] sm:$0xff]   ;;  %s955_s26 = sshll.u32 %s204_s25, 4  ;;  %s942_s28 = scalar_lea.sflag [#allocation4], %s1644_s6  ;;  %s1671_s26 = int_to_ptr.vmem [resolvable:$true] %s955_s26 }
  0x59   : > { %v1285_v3 = vld [vmem:[#allocation5 + $0x80] sm:$0xff]   ;;  %1132 = vmatpush3.bf16.msra.mxu0 %v1284_v2  ;;  %v1289_v7 = vld [vmem:[#allocation5 + $0x88] sm:$0xff]   ;;  %v1292_v10 = vld [vmem:[#allocation5 + $0x10] sm:$0xff]   ;;  %s1404_s29 = scalar_lea.vmem %s1671_s26, 256  ;;  %s1482_s16 = smov [#allocation7]  }
  0x5a   : > { %1154 = vmatpush3.bf16.msra.mxu1 %v1285_v3  ;;  %1133 = vmatprep.subr.bf16.mxu0 %v1286_v4  ;;  %v1293_v11 = vld [vmem:[#allocation5 + $0x90] sm:$0xff]   ;;  %v1294_v12 = vld [vmem:[#allocation5 + $0x58] sm:$0xff]   ;;  %v1298_v16 = vld [vmem:[#allocation5 + $0x60] sm:$0xff]   ;;  %p1405_p4 = scmp.ne.s32.totalorder %s1671_s26, %s1404_s29  ;;  %s1408_s23 = sshll.u32 %s1482_s16, 4  ;;  %s1409_s23 = int_to_ptr.vmem [resolvable:$false] %s1408_s23 }
  0x5b   : > { %1155 = vmatprep.subr.bf16.mxu1 %v1287_v5  ;;  %v1295_v13 = vld [vmem:[#allocation5 + $0xd8] sm:$0xff]   ;;  %v1299_v17 = vld [vmem:[#allocation5 + $0xe0] sm:$0xff]   ;;  %v1302_v20 = vld [vmem:[#allocation5 + $0x68] sm:$0xff]   ;;  %s1410_s30 = scalar_lea.vmem %s1409_s23, 512  ;;  %p1411_p10 = scmp.lt.s32.totalorder %s1671_s26, %s1409_s23 }
  0x5c   : > { %v1296_v14 = vld [vmem:[#allocation5 + $0x18] sm:$0xff]   ;;  %v1300_v18 = vld [vmem:[#allocation5 + $0x20] sm:$0xff]   ;;  %v1303_v21 = vld [vmem:[#allocation5 + $0xe8] sm:$0xff]   ;;  %p1406_p6 = pnand %p1405_p4, %p1596_p12  ;;  %p1412_p13 = scmp.lt.s32.totalorder %s1410_s30, %s1404_s29 }
  0x5d   : > { %1134 = vmatpush3.bf16.msra.mxu0 %v1288_v6  ;;  %v1297_v15 = vld [vmem:[#allocation5 + $0x98] sm:$0xff]   ;;  %v1301_v19 = vld [vmem:[#allocation5 + $0xa0] sm:$0xff]   ;;  %v1304_v22 = vld [vmem:[#allocation5 + $0x28] sm:$0xff]  }
  0x5e   : > { %1156 = vmatpush3.bf16.msra.mxu1 %v1289_v7  ;;  %1135 = vmatprep.subr.bf16.mxu0 %v1290_v8  ;;  %v1305_v23 = vld [vmem:[#allocation5 + $0xa8] sm:$0xff]   ;;  %v1306_v24 = vld [vmem:[#allocation5 + $0x70] sm:$0xff]   ;;  %v1310_v28 = vld [vmem:[#allocation5 + $0x78] sm:$0xff]   ;;  %p1407_p8 = pneg %p1406_p6  ;;  %p1413_p3 = por %p1412_p13, %p1411_p10 }
  0x5f   : > { %1157 = vmatprep.subr.bf16.mxu1 %v1291_v9  ;;  %v1307_v25 = vld [vmem:[#allocation5 + $0xf0] sm:$0xff]   ;;  %v1311_v29 = vld [vmem:[#allocation5 + $0xf8] sm:$0xff]   ;;  %v208_v32 = vld [vmem:[%s1648_s9] sm:$0xff] }
  0x60   : > { %v1308_v26 = vld [vmem:[#allocation5 + $0x30] sm:$0xff]   ;;  %v1312_v30 = vld [vmem:[#allocation5 + $0x38] sm:$0xff]   ;;  %v212_v33 = vld [vmem:[%s1648_s9 + $0x20] sm:$0xff]  ;;  %p1414_p7 = pnand %p1413_p3, %p1407_p8 }
  0x61   : > { %1136 = vmatpush3.bf16.msra.mxu0 %v1292_v10  ;;  %v1309_v27 = vld [vmem:[#allocation5 + $0xb0] sm:$0xff]   ;;  %v1313_v31 = vld [vmem:[#allocation5 + $0xb8] sm:$0xff]   ;;  %v209_v34 = vld [vmem:[%s1648_s9 + $0x8] sm:$0xff]  ;;  %v1051_v35 = vcombine.low %v208_v32, %v212_v33  ;;  %v1052_v36 = vcombine.high %v208_v32, %v212_v33 }
  0x62   : > { %1158 = vmatpush3.bf16.msra.mxu1 %v1293_v11  ;;  %1137 = vmatprep.subr.bf16.mxu0 %v1294_v12  ;;  %v213_v37 = vld [vmem:[%s1648_s9 + $0x28] sm:$0xff]  ;;  %v1314_v40 = vld [vmem:[#allocation5 + $0x140] sm:$0xff]   ;;  %v1322_v48 = vld [vmem:[#allocation5 + $0x150] sm:$0xff]  }
  0x63   : > { %1159 = vmatprep.subr.bf16.mxu1 %v1295_v13  ;;  %v1053_v38 = vcombine.low %v209_v34, %v213_v37  ;;  %v1054_v39 = vcombine.high %v209_v34, %v213_v37  ;;  %807 = vmatprep.mubr.bf16.mxu0 %v1052_v36  ;;  %v1315_v41 = vld [vmem:[#allocation5 + $0x1c0] sm:$0xff]   ;;  %v1318_v44 = vld [vmem:[#allocation5 + $0x148] sm:$0xff]   ;;  %v1323_v49 = vld [vmem:[#allocation5 + $0x1d0] sm:$0xff]  }
  0x64   : > { %v1316_v42 = vld [vmem:[#allocation5 + $0x100] sm:$0xff]   ;;  %v1319_v45 = vld [vmem:[#allocation5 + $0x1c8] sm:$0xff]   ;;  %v1324_v50 = vld [vmem:[#allocation5 + $0x110] sm:$0xff]  }
  0x65   : > { %1138 = vmatpush3.bf16.msra.mxu0 %v1296_v14  ;;  %848 = vmatprep.mubr.bf16.mxu1 %v1054_v39  ;;  %v1317_v43 = vld [vmem:[#allocation5 + $0x180] sm:$0xff]   ;;  %v1320_v46 = vld [vmem:[#allocation5 + $0x108] sm:$0xff]   ;;  %v1325_v51 = vld [vmem:[#allocation5 + $0x190] sm:$0xff]  }
  0x66   : > { %1160 = vmatpush3.bf16.msra.mxu1 %v1297_v15  ;;  %1139 = vmatprep.subr.bf16.mxu0 %v1298_v16  ;;  %v1321_v47 = vld [vmem:[#allocation5 + $0x188] sm:$0xff]   ;;  %v1326_v52 = vld [vmem:[#allocation5 + $0x158] sm:$0xff]   ;;  %v1330_v56 = vld [vmem:[#allocation5 + $0x160] sm:$0xff]  }
  0x67   : > { %1161 = vmatprep.subr.bf16.mxu1 %v1299_v17  ;;  %v1327_v53 = vld [vmem:[#allocation5 + $0x1d8] sm:$0xff]   ;;  %v1331_v57 = vld [vmem:[#allocation5 + $0x1e0] sm:$0xff]   ;;  %v1334_v60 = vld [vmem:[#allocation5 + $0x168] sm:$0xff]  }
  0x68   : > { %v1328_v54 = vld [vmem:[#allocation5 + $0x118] sm:$0xff]   ;;  %v1332_v58 = vld [vmem:[#allocation5 + $0x120] sm:$0xff]   ;;  %v1335_v61 = vld [vmem:[#allocation5 + $0x1e8] sm:$0xff]  }
  0x69   : > { %1140 = vmatpush3.bf16.msra.mxu0 %v1300_v18  ;;  %v1329_v55 = vld [vmem:[#allocation5 + $0x198] sm:$0xff]   ;;  %v1333_v59 = vld [vmem:[#allocation5 + $0x1a0] sm:$0xff]   ;;  %v1336_v62 = vld [vmem:[#allocation5 + $0x128] sm:$0xff]  }
  0x6a   : > { %1162 = vmatpush3.bf16.msra.mxu1 %v1301_v19  ;;  %1141 = vmatprep.subr.bf16.mxu0 %v1302_v20  ;;  %v1337_v63 = vld [vmem:[#allocation5 + $0x1a8] sm:$0xff]   ;;  %v1338_v0 = vld [vmem:[#allocation5 + $0x170] sm:$0xff]   ;;  %v1342_v4 = vld [vmem:[#allocation5 + $0x178] sm:$0xff]  }
  0x6b   : > { %1163 = vmatprep.subr.bf16.mxu1 %v1303_v21  ;;  %v1339_v1 = vld [vmem:[#allocation5 + $0x1f0] sm:$0xff]   ;;  %v1343_v5 = vld [vmem:[#allocation5 + $0x1f8] sm:$0xff]   ;;  %v1050_v18 = vld [vmem:[%s1722_s2] ss:$0 sm:$0xff] }
  0x6c   : > { %v1340_v2 = vld [vmem:[#allocation5 + $0x130] sm:$0xff]   ;;  %v1344_v6 = vld [vmem:[#allocation5 + $0x138] sm:$0xff]  }
  0x6d   : > { %1142 = vmatpush3.bf16.msra.mxu0 %v1304_v22  ;;  %v1341_v3 = vld [vmem:[#allocation5 + $0x1b0] sm:$0xff]   ;;  %v1345_v7 = vld [vmem:[#allocation5 + $0x1b8] sm:$0xff]  }
  0x6e   : > { %1164 = vmatpush3.bf16.msra.mxu1 %v1305_v23  ;;  %1143 = vmatprep.subr.bf16.mxu0 %v1306_v24  ;;  %v210_v8 = vld [vmem:[%s1648_s9 + $0x10] sm:$0xff]  ;;  %v211_v12 = vld [vmem:[%s1648_s9 + $0x18] sm:$0xff] }
  0x6f   : > { %1165 = vmatprep.subr.bf16.mxu1 %v1307_v25  ;;  %v214_v9 = vld [vmem:[%s1648_s9 + $0x30] sm:$0xff]  ;;  %v215_v13 = vld [vmem:[%s1648_s9 + $0x38] sm:$0xff] }
  0x70   : > { %v1055_v10 = vcombine.low %v210_v8, %v214_v9  ;;  %v1056_v11 = vcombine.high %v210_v8, %v214_v9  ;;  %v1057_v14 = vcombine.low %v211_v12, %v215_v13  ;;  %v1058_v15 = vcombine.high %v211_v12, %v215_v13 }
  0x71   : > { %1144 = vmatpush3.bf16.msra.mxu0 %v1308_v26 }
  0x72   : > { %1166 = vmatpush3.bf16.msra.mxu1 %v1309_v27  ;;  %1145 = vmatprep.subr.bf16.mxu0 %v1310_v28 }
  0x73   : > { %1167 = vmatprep.subr.bf16.mxu1 %v1311_v29 }
  0x75   : > { %1146 = vmatpush3.bf16.msra.mxu0 %v1312_v30 }
  0x76   : > { %1168 = vmatpush3.bf16.msra.mxu1 %v1313_v31  ;;  %1175 = vmatprep.subr.bf16.mxu0 %v1314_v40 }
  0x77   : > { %1197 = vmatprep.subr.bf16.mxu1 %v1315_v41 }
  0x78   : > { %808 = vmatmul.mubr.bf16.vlgmr.msra.gmra.mrb[0].mxu0 %v1051_v35 }
  0x79   : > { %849 = vmatmul.mubr.bf16.vlgmr.msra.gmra.mrb[0].mxu1 %v1053_v38  ;;  %1176 = vmatpush3.bf16.msra.mxu0 %v1316_v42 }
  0x7a   : > { %1198 = vmatpush3.bf16.msra.mxu1 %v1317_v43  ;;  %1177 = vmatprep.subr.bf16.mxu0 %v1318_v44 }
  0x7b   : > { %1199 = vmatprep.subr.bf16.mxu1 %v1319_v45  ;;  %889 = vmatprep.mubr.bf16.mxu0 %v1056_v11 }
  0x7c   : > { %930 = vmatprep.mubr.bf16.mxu1 %v1058_v15 }
  0x7d   : > { %1178 = vmatpush3.bf16.msra.mxu0 %v1320_v46 }
  0x7e   : > { %1200 = vmatpush3.bf16.msra.mxu1 %v1321_v47  ;;  %1179 = vmatprep.subr.bf16.mxu0 %v1322_v48 }
  0x7f   : > { %1201 = vmatprep.subr.bf16.mxu1 %v1323_v49 }
  0x81   : > { %1180 = vmatpush3.bf16.msra.mxu0 %v1324_v50 }
  0x82   : > { %1202 = vmatpush3.bf16.msra.mxu1 %v1325_v51  ;;  %1181 = vmatprep.subr.bf16.mxu0 %v1326_v52 }
  0x83   : > { %1203 = vmatprep.subr.bf16.mxu1 %v1327_v53 }
  0x85   : > { %1182 = vmatpush3.bf16.msra.mxu0 %v1328_v54 }
  0x86   : > { %1204 = vmatpush3.bf16.msra.mxu1 %v1329_v55  ;;  %1183 = vmatprep.subr.bf16.mxu0 %v1330_v56 }
  0x87   : > { %1205 = vmatprep.subr.bf16.mxu1 %v1331_v57 }
  0x89   : > { %1184 = vmatpush3.bf16.msra.mxu0 %v1332_v58 }
  0x8a   : > { %1206 = vmatpush3.bf16.msra.mxu1 %v1333_v59  ;;  %1185 = vmatprep.subr.bf16.mxu0 %v1334_v60 }
  0x8b   : > { %1207 = vmatprep.subr.bf16.mxu1 %v1335_v61 }
  0x8d   : > { %1186 = vmatpush3.bf16.msra.mxu0 %v1336_v62 }
  0x8e   : > { %1208 = vmatpush3.bf16.msra.mxu1 %v1337_v63  ;;  %1187 = vmatprep.subr.bf16.mxu0 %v1338_v0 }
  0x8f   : > { %1209 = vmatprep.subr.bf16.mxu1 %v1339_v1 }
  0x91   : > { %1188 = vmatpush3.bf16.msra.mxu0 %v1340_v2 }
  0x92   : > { %1210 = vmatpush3.bf16.msra.mxu1 %v1341_v3  ;;  %1189 = vmatprep.subr.bf16.mxu0 %v1342_v4 }
  0x93   : > { %1211 = vmatprep.subr.bf16.mxu1 %v1343_v5 }
  0x95   : > { %1190 = vmatpush3.bf16.msra.mxu0 %v1344_v6 }
  0x96   : > { %1212 = vmatpush3.bf16.msra.mxu1 %v1345_v7 }
  0x98   : > { %890 = vmatmul.mubr.bf16.vlgmr.msra.gmra.mrb[4].mxu0 %v1055_v10 }
  0x99   : > { %931 = vmatmul.mubr.bf16.vlgmr.msra.gmra.mrb[4].mxu1 %v1057_v14 }
 0x14b   : > { %v1147_v16 = vpop.f32.mrb[0].mxu0 }
 0x14c   : > { %v1169_v17 = vpop.f32.mrb[0].mxu1  ;;  %v1148_v19 = vpop.f32.mrb[1].mxu0 }
 0x14d   : > { %v1149_v20 = vadd.f32 %v1148_v19, %v1147_v16  ;;  %v1170_v21 = vpop.f32.mrb[1].mxu1  ;;  %v1150_v22 = vpop.f32.mrb[2].mxu0 }
 0x14e   : > { %v1171_v23 = vadd.f32 %v1170_v21, %v1169_v17  ;;  %v1172_v24 = vpop.f32.mrb[2].mxu1  ;;  %v1151_v25 = vpop.f32.mrb[3].mxu0 }
 0x14f   : > { %v810_v26 = vadd.f32 %v1149_v20, %v1050_v18  ;;  %v1152_v27 = vadd.f32 %v1151_v25, %v1150_v22  ;;  %v1173_v28 = vpop.f32.mrb[3].mxu1 }
 0x150   : > { %v1174_v29 = vadd.f32 %v1173_v28, %v1172_v24 }
 0x151   : > { %v851_v30 = vadd.f32 %v1171_v23, %v810_v26  ;;  %v813_v31 = vadd.f32 %v1152_v27, %v1050_v18 }
 0x153   : > { %v854_v32 = vadd.f32 %v1174_v29, %v813_v31 }
 0x16b   : > { %v1191_v33 = vpop.f32.mrb[4].mxu0 }
 0x16c   : > { %v1213_v34 = vpop.f32.mrb[4].mxu1  ;;  %v1192_v35 = vpop.f32.mrb[5].mxu0 }
 0x16d   : > { %v1193_v36 = vadd.f32 %v1192_v35, %v1191_v33  ;;  %v1214_v37 = vpop.f32.mrb[5].mxu1  ;;  %v1194_v38 = vpop.f32.mrb[6].mxu0 }
 0x16e   : > { %v1215_v39 = vadd.f32 %v1214_v37, %v1213_v34  ;;  %v1216_v40 = vpop.f32.mrb[6].mxu1  ;;  %v1195_v41 = vpop.f32.mrb[7].mxu0 }
 0x16f   : > { %v892_v42 = vadd.f32 %v1193_v36, %v851_v30  ;;  %v1196_v43 = vadd.f32 %v1195_v41, %v1194_v38  ;;  %v1217_v44 = vpop.f32.mrb[7].mxu1 }
 0x170   : > { %v1218_v45 = vadd.f32 %v1217_v44, %v1216_v40 }
 0x171   : > { %v933_v46 = vadd.f32 %v1215_v39, %v892_v42  ;;  %v895_v47 = vadd.f32 %v1196_v43, %v854_v32 }
 0x173   : > { %939 = vst [vmem:[%s204_s25] sm:$0xff] %v933_v46  ;;  %v936_v48 = vadd.f32 %v1218_v45, %v895_v47 }
 0x175   : > { %940 = vst [vmem:[%s204_s25 + $0x8] sm:$0xff] %v936_v48 }
 0x176   : > { %1417 = shalt.err (!%p1414_p7)
}
 0x177   : > { %s1418_s22 = scalar_lea.hbm %s1676_s27, 256  ;;  %s1422_s9 = scalar_lea.hbm %s1723_s3, 512 }
 0x178   : > { %p1419_p9 = scmp.ne.s32.totalorder %s1676_s27, %s1418_s22  ;;  %p1423_p5 = scmp.lt.u32.totalorder %s1676_s27, %s1723_s3 }
 0x179   : > { %p1424_p11 = scmp.lt.u32.totalorder %s1422_s9, %s1418_s22  ;;  %p1426_p4 = scmp.lt.u32.totalorder %s1418_s22, %s1676_s27 }
 0x17a   : > { %p1420_p2 = pnand %p1419_p9, %p1596_p12 }
 0x17b   : > { %p1425_p1 = por %p1424_p11, %p1423_p5 }
 0x17c   : > { %p1421_p0 = pneg %p1420_p2 }
 0x17d   : > { %p1427_p6 = por %p1426_p4, %p1425_p1 }
 0x17f   : > { %p1428_p8 = pnand %p1427_p6, %p1421_p0 }
 0x181   : > { %1431 = shalt.err (!%p1428_p8)
}
 0x182   : > { %s1483_s4 = smov 128   ;;  %s1484_s25 = smov 8  }
 0x183   : > { %1225 = dma.vmem_to_hbm [thread:$0]  (%p1596_p12), %s1671_s26, 256, %s1676_s27, %s942_s28, %s1483_s4, %s1483_s4, %s1484_s25  }
 0x184 PF: > { %s970_s5 = sand.u32 1, %s1462_s12   ;;  %p1738_p10 = scmp.ne.s32.totalorder %s1728_s19, 0 }
 0x185   : > { %p1739_p13 = scmp.ge.s32.totalorder %s1474_s15, 2  ;;  %s971_s10 = scalar_lea.sflag [#allocation4], %s970_s5 }
 0x187   : > { %p1236_p3 = pnand %p1739_p13, %p1738_p10 }
 0x189   : > { %1457 = dma.done.wait (!%p1236_p3), %s971_s10, 256  }
 0x18a   : > { %1459 = vsyncadd (!%p1236_p3), %s971_s10, 4294967040  ;;  %p17_p7 = scmp.ge.s32.totalorder %s1561_s24, 4   ;;  %s1740_s12 = smov %s1466_s13 }
 0x18b   : > { %s1741_s13 = smov %s1470_s14  ;;  %s1742_s14 = smov %s1592_s17 }
 0x18c   : > { %s1743_s15 = smov %s1561_s24  ;;  %19 = sbr.rel (!%p17_p7) target bundleno = 6 (0x6), region = 81 }
 0x193   :  { %976 = vsyncpa [#allocation3], 1 }
 0x194   :  { %978 = vsyncpa [#allocation3 + $0x1], 1 }
 0x195   :  { %979 = vsyncpa [#allocation6], 1 }
 0x196   :  { %980 = vsyncpa [#allocation4], 1 }
 0x197   :  { %982 = vsyncpa [#allocation4 + $0x1], 1 }

</bundles_post_ra>
